<compile_context>
chip_gen: v7x
topology: tpu7x:2x2x1
jax: 0.10.0
libtpu: 0.0.40
codegen_flags: <defaults>
</compile_context>

<pallas_src>
import jax
import jax.numpy as jnp
from jax.experimental import pallas as pl
from jax.experimental.pallas import tpu as pltpu


def _round_up(n, m):
    return (n + m - 1) // m * m


# ----------------------------------------------------------------------------
# Input-projection / FC kernels (row-parallel, off the serial path).
# Gate column layout of the 6*Hp-wide result: [f_r f_z f_n | b_r b_z b_n],
# each gate block Hp (=multiple of 128) wide -> all slices lane-aligned.
# ----------------------------------------------------------------------------
def _proj_x_kernel(x_ref, w_ref, b_ref, gf_ref, gb_ref):
    g3 = gf_ref.shape[-1]
    acc = (jnp.dot(x_ref[...], w_ref[...], preferred_element_type=jnp.float32)
           + b_ref[...])
    gf_ref[...] = acc[:, :g3].astype(gf_ref.dtype)
    gb_ref[...] = acc[:, g3:].astype(gb_ref.dtype)


def _proj_fb_kernel(xf_ref, xb_ref, wf_ref, wb_ref, b_ref, gf_ref, gb_ref):
    g3 = gf_ref.shape[-1]
    acc = (jnp.dot(xf_ref[...], wf_ref[...], preferred_element_type=jnp.float32)
           + jnp.dot(xb_ref[...], wb_ref[...], preferred_element_type=jnp.float32)
           + b_ref[...])
    gf_ref[...] = acc[:, :g3].astype(gf_ref.dtype)
    gb_ref[...] = acc[:, g3:].astype(gb_ref.dtype)


def _fc_kernel(xf_ref, xb_ref, wf_ref, wb_ref, b_ref, o_ref):
    o_ref[...] = (jnp.dot(xf_ref[...], wf_ref[...], preferred_element_type=jnp.float32)
                  + jnp.dot(xb_ref[...], wb_ref[...], preferred_element_type=jnp.float32)
                  + b_ref[...]).astype(o_ref.dtype)


def _row_tile(n):
    # Whole array as one block when small; 512-row tiles otherwise
    # (mem-bound kernels reach ~85% of HBM roofline at 512 vs ~63% at 256).
    return n if n <= 512 else 512


def _proj_from_x(x, w, b, Hp, io_dtype):
    N, D = x.shape
    G = w.shape[1]                     # 6*Hp
    rt = _row_tile(N)
    return pl.pallas_call(
        _proj_x_kernel,
        out_shape=(jax.ShapeDtypeStruct((N, 3 * Hp), io_dtype),
                   jax.ShapeDtypeStruct((N, 3 * Hp), io_dtype)),
        grid=(pl.cdiv(N, rt),),
        in_specs=[
            pl.BlockSpec((rt, D), lambda i: (i, 0)),
            pl.BlockSpec((D, G), lambda i: (0, 0)),
            pl.BlockSpec((1, G), lambda i: (0, 0)),
        ],
        out_specs=(pl.BlockSpec((rt, 3 * Hp), lambda i: (i, 0)),
                   pl.BlockSpec((rt, 3 * Hp), lambda i: (i, 0))),
        compiler_params=pltpu.CompilerParams(
            dimension_semantics=("parallel",)),
    )(x, w, b)


def _proj_from_fb(xf, xb, w_top, w_bot, b, Hp, io_dtype):
    N, D = xf.shape
    G = w_top.shape[1]                 # 6*Hp
    rt = _row_tile(N)
    return pl.pallas_call(
        _proj_fb_kernel,
        out_shape=(jax.ShapeDtypeStruct((N, 3 * Hp), io_dtype),
                   jax.ShapeDtypeStruct((N, 3 * Hp), io_dtype)),
        grid=(pl.cdiv(N, rt),),
        in_specs=[
            pl.BlockSpec((rt, D), lambda i: (i, 0)),
            pl.BlockSpec((rt, D), lambda i: (i, 0)),
            pl.BlockSpec((D, G), lambda i: (0, 0)),
            pl.BlockSpec((D, G), lambda i: (0, 0)),
            pl.BlockSpec((1, G), lambda i: (0, 0)),
        ],
        out_specs=(pl.BlockSpec((rt, 3 * Hp), lambda i: (i, 0)),
                   pl.BlockSpec((rt, 3 * Hp), lambda i: (i, 0))),
        compiler_params=pltpu.CompilerParams(
            dimension_semantics=("parallel",)),
    )(xf, xb, w_top, w_bot, b)


def _fc(xf, xb, w_top, w_bot, b):
    N, D = xf.shape
    Dout = w_top.shape[1]              # Ep (lane-dense, multiple of 128)
    rt = _row_tile(N)
    return pl.pallas_call(
        _fc_kernel,
        out_shape=jax.ShapeDtypeStruct((N, Dout), jnp.float32),
        grid=(pl.cdiv(N, rt),),
        in_specs=[
            pl.BlockSpec((rt, D), lambda i: (i, 0)),
            pl.BlockSpec((rt, D), lambda i: (i, 0)),
            pl.BlockSpec((D, Dout), lambda i: (0, 0)),
            pl.BlockSpec((D, Dout), lambda i: (0, 0)),
            pl.BlockSpec((1, Dout), lambda i: (0, 0)),
        ],
        out_specs=pl.BlockSpec((rt, Dout), lambda i: (i, 0)),
        compiler_params=pltpu.CompilerParams(
            dimension_semantics=("parallel",)),
    )(xf, xb, w_top, w_bot, b)


# ----------------------------------------------------------------------------
# Fused bidirectional GRU recurrence, chunked over time.
#   grid = (num_chunks,);  fwd chunk i, bwd chunk (nc-1-i).
#   Hidden states live in vregs inside the chunk loop, and in persistent VMEM
#   scratch across chunks.  Gate order matches PyTorch (r, z, n).
#   gi_* already contain  x @ W_ih + b_ih + [b_hr, b_hz, 0].
#   whh_cat is block-diagonal: [[W_hh_f, 0], [0, W_hh_b]]  -> one dot/step.
# ----------------------------------------------------------------------------
def _bigru_kernel(gif_ref, gib_ref, whh_ref, bhn_f_ref, bhn_b_ref,
                  out_f_ref, out_b_ref, hf_sc, hb_sc):
    Tc, Bp, G3 = gif_ref.shape
    Hp = G3 // 3
    mm_dt = whh_ref.dtype

    @pl.when(pl.program_id(0) == 0)
    def _():
        hf_sc[...] = jnp.zeros_like(hf_sc)
        hb_sc[...] = jnp.zeros_like(hb_sc)

    # Hoist the (tiny) bias broadcasts out of the serial loop.
    bhn_f = jnp.broadcast_to(bhn_f_ref[...], (Bp, Hp))
    bhn_b = jnp.broadcast_to(bhn_b_ref[...], (Bp, Hp))

    def step(s, carry):
        hf, hb = carry                                        # f32 vreg carries
        gi_f = gif_ref[s].astype(jnp.float32)                 # (Bp, 3Hp)
        gi_b = gib_ref[Tc - 1 - s].astype(jnp.float32)
        # One fused MXU dot for both directions (K = 2*Hp).
        h_cat = jnp.concatenate([hf.astype(mm_dt), hb.astype(mm_dt)], axis=1)
        gh = jnp.dot(h_cat, whh_ref[...],
                     preferred_element_type=jnp.float32)      # (Bp, 6Hp)
        ghf = gh[:, :G3]
        ghb = gh[:, G3:]

        rf = jax.nn.sigmoid(gi_f[:, 0:Hp] + ghf[:, 0:Hp])
        zf = jax.nn.sigmoid(gi_f[:, Hp:2 * Hp] + ghf[:, Hp:2 * Hp])
        nf = jnp.tanh(gi_f[:, 2 * Hp:] + rf * (ghf[:, 2 * Hp:] + bhn_f))
        hf_new = (1.0 - zf) * nf + zf * hf

        rb = jax.nn.sigmoid(gi_b[:, 0:Hp] + ghb[:, 0:Hp])
        zb = jax.nn.sigmoid(gi_b[:, Hp:2 * Hp] + ghb[:, Hp:2 * Hp])
        nb = jnp.tanh(gi_b[:, 2 * Hp:] + rb * (ghb[:, 2 * Hp:] + bhn_b))
        hb_new = (1.0 - zb) * nb + zb * hb

        out_f_ref[s] = hf_new.astype(out_f_ref.dtype)
        out_b_ref[Tc - 1 - s] = hb_new.astype(out_b_ref.dtype)
        return hf_new, hb_new

    hf0 = hf_sc[...]
    hb0 = hb_sc[...]
    hfT, hbT = jax.lax.fori_loop(0, Tc, step, (hf0, hb0), unroll=2)
    hf_sc[...] = hfT
    hb_sc[...] = hbT


def _recurrence_vmem_limit(Tc, Bp, Hp, io_dtype, mm_dtype):
    io = jnp.dtype(io_dtype).itemsize
    gi_blk = Tc * Bp * 3 * Hp * io
    out_blk = Tc * Bp * Hp * io
    w = (2 * Hp) * (6 * Hp) * jnp.dtype(mm_dtype).itemsize
    scratch = 2 * Bp * Hp * 4
    # 2 directions x double-buffered gi/out chunks + weights (x2 buffers)
    # + scratch + slack for compiler-internal scratch.
    need = 2 * 2 * (gi_blk + out_blk) + 2 * w + scratch + (2 << 20)
    return int(min(max(need, 4 << 20), 48 << 20))


def _bigru(gi_f, gi_b, whh_cat, bhn_f, bhn_b, Tc, io_dtype):
    Tp, Bp, G3 = gi_f.shape
    Hp = G3 // 3
    nc = Tp // Tc
    mm_dtype = whh_cat.dtype
    return pl.pallas_call(
        _bigru_kernel,
        out_shape=(jax.ShapeDtypeStruct((Tp, Bp, Hp), io_dtype),
                   jax.ShapeDtypeStruct((Tp, Bp, Hp), io_dtype)),
        grid=(nc,),
        in_specs=[
            pl.BlockSpec((Tc, Bp, G3), lambda i: (i, 0, 0)),
            pl.BlockSpec((Tc, Bp, G3), lambda i: (nc - 1 - i, 0, 0)),
            pl.BlockSpec((2 * Hp, 2 * G3), lambda i: (0, 0)),
            pl.BlockSpec((1, Hp), lambda i: (0, 0)),
            pl.BlockSpec((1, Hp), lambda i: (0, 0)),
        ],
        out_specs=(pl.BlockSpec((Tc, Bp, Hp), lambda i: (i, 0, 0)),
                   pl.BlockSpec((Tc, Bp, Hp), lambda i: (nc - 1 - i, 0, 0))),
        scratch_shapes=[pltpu.VMEM((Bp, Hp), jnp.float32),
                        pltpu.VMEM((Bp, Hp), jnp.float32)],
        compiler_params=pltpu.CompilerParams(
            dimension_semantics=("arbitrary",),      # serial recurrence
            vmem_limit_bytes=_recurrence_vmem_limit(Tc, Bp, Hp, io_dtype,
                                                    mm_dtype)),
    )(gi_f, gi_b, whh_cat, bhn_f, bhn_b)


# ----------------------------------------------------------------------------
# Parameters (match nn.GRU(emb, emb, layer_num, bidirectional) + Linear(2E,E)).
# Weights stored pre-transposed for x @ W.
# ----------------------------------------------------------------------------
def init_params(key, emb_dim, layer_num=2):
    H = emb_dim
    bound = 1.0 / jnp.sqrt(jnp.float32(H))
    params = {}
    keys = list(jax.random.split(key, layer_num * 2 * 4 + 2))

    def u(shape):
        k = keys.pop(0)
        return jax.random.uniform(k, shape, jnp.float32, -bound, bound)

    for layer in range(layer_num):
        d_in = emb_dim if layer == 0 else 2 * emb_dim
        for tag in ("f", "b"):
            w_ih = u((d_in, 3 * H))
            w_hh = u((H, 3 * H))
            b_ih = u((1, 3 * H))
            b_hh = u((1, 3 * H))
            params[f"l{layer}_{tag}"] = (w_ih, w_hh, b_ih, b_hh)

    params["fc"] = (u((2 * emb_dim, emb_dim)), u((1, emb_dim)))
    return params


# --- padding helpers (all padding is exact zeros -> real outputs unchanged) --
def _pad_cols(a, Cp):
    return jnp.pad(a, ((0, 0), (0, Cp - a.shape[1])))


def _pad_rows(a, Rp):
    return jnp.pad(a, ((0, Rp - a.shape[0]), (0, 0)))


def _pad_gate_cols(w, H, Hp):
    """(D, 3H) -> (D, 3Hp): each gate block starts on a 128-lane boundary."""
    if Hp == H:
        return w
    parts = [jnp.pad(w[:, g * H:(g + 1) * H], ((0, 0), (0, Hp - H)))
             for g in range(3)]
    return jnp.concatenate(parts, axis=1)


def _prepare_params(params, layer_num, H, Hp, Ep, mm_dtype):
    """Fuse/repack raw params: padded lane-aligned gate layout, fused r/z
    biases, split weights (no concatenates in the data path), and a
    block-diagonal W_hh so the recurrence does one dot per step."""
    prep = {"layers": []}
    zero_h = jnp.zeros((1, H), jnp.float32)
    for layer in range(layer_num):
        w_ih_f, w_hh_f, b_ih_f, b_hh_f = params[f"l{layer}_f"]
        w_ih_b, w_hh_b, b_ih_b, b_hh_b = params[f"l{layer}_b"]
        # fused bias = b_ih + [b_hr, b_hz, 0]  (b_hn stays inside the loop)
        fb_f = b_ih_f + jnp.concatenate([b_hh_f[:, :2 * H], zero_h], axis=1)
        fb_b = b_ih_b + jnp.concatenate([b_hh_b[:, :2 * H], zero_h], axis=1)
        bias = jnp.concatenate([_pad_gate_cols(fb_f, H, Hp),
                                _pad_gate_cols(fb_b, H, Hp)], axis=1)  # (1,6Hp)

        whh_f_p = _pad_rows(_pad_gate_cols(w_hh_f, H, Hp), Hp)        # (Hp,3Hp)
        whh_b_p = _pad_rows(_pad_gate_cols(w_hh_b, H, Hp), Hp)
        whh_cat = jnp.zeros((2 * Hp, 6 * Hp), jnp.float32)
        whh_cat = whh_cat.at[:Hp, :3 * Hp].set(whh_f_p)
        whh_cat = whh_cat.at[Hp:, 3 * Hp:].set(whh_b_p)

        entry = {
            "bias": bias,                                    # f32 (1, 6Hp)
            "whh_cat": whh_cat.astype(mm_dtype),             # (2Hp, 6Hp)
            "bhn_f": _pad_cols(b_hh_f[:, 2 * H:], Hp),       # f32 (1, Hp)
            "bhn_b": _pad_cols(b_hh_b[:, 2 * H:], Hp),
        }
        if layer == 0:
            entry["w_x"] = jnp.concatenate(
                [_pad_gate_cols(w_ih_f, H, Hp),
                 _pad_gate_cols(w_ih_b, H, Hp)], axis=1).astype(mm_dtype)
        else:
            w_top = jnp.concatenate([_pad_gate_cols(w_ih_f[:H], H, Hp),
                                     _pad_gate_cols(w_ih_b[:H], H, Hp)], axis=1)
            w_bot = jnp.concatenate([_pad_gate_cols(w_ih_f[H:], H, Hp),
                                     _pad_gate_cols(w_ih_b[H:], H, Hp)], axis=1)
            entry["w_top"] = _pad_rows(w_top, Hp).astype(mm_dtype)   # (Hp, 6Hp)
            entry["w_bot"] = _pad_rows(w_bot, Hp).astype(mm_dtype)
        prep["layers"].append(entry)

    w_fc, b_fc = params["fc"]
    E = H
    prep["fc_w_top"] = _pad_rows(_pad_cols(w_fc[:E], Ep), Hp).astype(mm_dtype)
    prep["fc_w_bot"] = _pad_rows(_pad_cols(w_fc[E:], Ep), Hp).astype(mm_dtype)
    prep["fc_b"] = _pad_cols(b_fc, Ep)
    return prep


def _pad_time_identity(gi, Tp, Hp):
    """Pad gi along T with 'identity' steps: z pre-activation = +1e4 ->
    sigmoid==1 exactly -> h_new == h, so both directions pass through
    padding untouched (padded outputs are discarded)."""
    T = gi.shape[0]
    if Tp == T:
        return gi
    pad = jnp.zeros((Tp - T, gi.shape[1], gi.shape[2]), gi.dtype)
    pad = pad.at[:, :, Hp:2 * Hp].set(jnp.asarray(1e4, gi.dtype))
    return jnp.concatenate([gi, pad], axis=0)


def gru_path_encoder(src, params, layer_num=2, mm_dtype=jnp.bfloat16,
                     time_chunk=128):
    """src: (B, T, E) batch-first (PyTorch layout).  Returns (B, T, E)."""
    B, T, E = src.shape
    H = E
    Hp = _round_up(H, 128)            # lane-aligned gate blocks
    Bp = _round_up(B, 8)              # sublane-aligned rows
    Ep = _round_up(E, 128)            # lane-dense FC output
    io_dtype = mm_dtype               # bf16 intermediates (f32 for strict check)
    Tc = T if T <= time_chunk else time_chunk
    Tp = pl.cdiv(T, Tc) * Tc

    prep = _prepare_params(params, layer_num, H, Hp, Ep, mm_dtype)

    x = jnp.transpose(src, (1, 0, 2)).astype(mm_dtype)       # (T, B, E)
    x = jnp.pad(x, ((0, 0), (0, Bp - B), (0, 0)))            # (T, Bp, E)

    out_f = out_b = None
    for layer in range(layer_num):
        p = prep["layers"][layer]
        if layer == 0:
            gf, gb = _proj_from_x(x.reshape(T * Bp, E), p["w_x"], p["bias"],
                                  Hp, io_dtype)
        else:
            xf = out_f[:T].reshape(T * Bp, Hp)
            xb = out_b[:T].reshape(T * Bp, Hp)
            gf, gb = _proj_from_fb(xf, xb, p["w_top"], p["w_bot"], p["bias"],
                                   Hp, io_dtype)
        gf = _pad_time_identity(gf.reshape(T, Bp, 3 * Hp), Tp, Hp)
        gb = _pad_time_identity(gb.reshape(T, Bp, 3 * Hp), Tp, Hp)
        out_f, out_b = _bigru(gf, gb, p["whh_cat"], p["bhn_f"], p["bhn_b"],
                              Tc, io_dtype)

    # Final Linear, consuming (out_f, out_b) directly (no concatenate).
    xf = out_f[:T].reshape(T * Bp, Hp)
    xb = out_b[:T].reshape(T * Bp, Hp)
    y = _fc(xf, xb, prep["fc_w_top"], prep["fc_w_bot"], prep["fc_b"])
    y = y.reshape(T, Bp, Ep)[:, :B, :E]                       # drop padding
    return jnp.transpose(y, (1, 0, 2))                        # (B, T, E)


# ----------------------------------------------------------------------------
# Pure-JAX f32 reference (same math, raw params) for the correctness check.
# ----------------------------------------------------------------------------
def _gru_cell_ref(x, h, w_ih, w_hh, b_ih, b_hh):
    H = h.shape[-1]
    gi = x @ w_ih + b_ih
    gh = h @ w_hh + b_hh
    r = jax.nn.sigmoid(gi[:, :H] + gh[:, :H])
    z = jax.nn.sigmoid(gi[:, H:2 * H] + gh[:, H:2 * H])
    n = jnp.tanh(gi[:, 2 * H:] + r * gh[:, 2 * H:])
    return (1.0 - z) * n + z * h


def _gru_dir_ref(x_tbd, w_ih, w_hh, b_ih, b_hh, reverse):
    T, B, _ = x_tbd.shape
    H = w_hh.shape[0]
    h = jnp.zeros((B, H), jnp.float32)
    outs = [None] * T
    order = range(T - 1, -1, -1) if reverse else range(T)
    for t in order:
        h = _gru_cell_ref(x_tbd[t], h, w_ih, w_hh, b_ih, b_hh)
        outs[t] = h
    return jnp.stack(outs, axis=0)


def reference(src, params, layer_num=2):
    B, T, E = src.shape
    x = jnp.transpose(src, (1, 0, 2)).astype(jnp.float32)
    for layer in range(layer_num):
        f = _gru_dir_ref(x, *params[f"l{layer}_f"], reverse=False)
        b = _gru_dir_ref(x, *params[f"l{layer}_b"], reverse=True)
        x = jnp.concatenate([f, b], axis=-1)
    w_fc, b_fc = params["fc"]
    y = x.reshape(T * B, 2 * E) @ w_fc + b_fc
    return jnp.transpose(y.reshape(T, B, E), (1, 0, 2))


if __name__ == "__main__":
    EMB, LAYERS = 32, 2
    B, T = 2, 8

    key = jax.random.PRNGKey(0)
    k_param, k_src = jax.random.split(key)
    params = init_params(k_param, EMB, LAYERS)
    src = jax.random.normal(k_src, (B, T, EMB), jnp.float32)

    ref = jax.block_until_ready(reference(src, params, LAYERS))

    # Strict check: f32 matmuls / f32 intermediates must match the reference.
    out_f32 = jax.block_until_ready(
        gru_path_encoder(src, params, LAYERS, mm_dtype=jnp.float32))
    assert out_f32.shape == (B, T, EMB), out_f32.shape
    err32 = float(jnp.max(jnp.abs(out_f32 - ref)))
    assert err32 < 1e-4, err32

    # Default perf config: bf16 MXU operands and bf16 gi / layer outputs,
    # f32 accumulation and gate math.  Looser tolerance for bf16 rounding.
    out_bf16 = jax.block_until_ready(
        gru_path_encoder(src, params, LAYERS, mm_dtype=jnp.bfloat16))
    assert out_bf16.shape == (B, T, EMB), out_bf16.shape
    err16 = float(jnp.max(jnp.abs(out_bf16 - ref)))
    assert err16 < 1e-1, err16

    print("KERNEL_OK")
</pallas_src>

<mosaic_0001>
module attributes {stable_mosaic.version = 11 : i64} {
  func.func @_proj_x_kernel(%arg0: i32, %arg1: memref<64x32xf32, #tpu.memory_space<vmem>>, %arg2: memref<32x768xf32, #tpu.memory_space<vmem>>, %arg3: memref<1x768xf32, #tpu.memory_space<vmem>>, %arg4: memref<64x384xf32, #tpu.memory_space<vmem>>, %arg5: memref<64x384xf32, #tpu.memory_space<vmem>>) attributes {dimension_semantics = [#tpu.dimension_semantics<parallel>], iteration_bounds = array<i64: 1>, scalar_prefetch = 0 : i64, scratch_operands = 0 : i64, tpu.core_type = #tpu.core_type<tc>, window_params = [{transform_indices = @transform_0, window_bounds = array<i64: 64, 32>}, {pipeline_mode = #tpu.pipeline_mode<synchronous>, transform_indices = @transform_1, window_bounds = array<i64: 32, 768>}, {pipeline_mode = #tpu.pipeline_mode<synchronous>, transform_indices = @transform_2, window_bounds = array<i64: 1, 768>}, {transform_indices = @transform_3, window_bounds = array<i64: 64, 384>}, {transform_indices = @transform_4, window_bounds = array<i64: 64, 384>}]} {
    %c0 = arith.constant 0 : index
    %c0_0 = arith.constant 0 : index
    %0 = vector.load %arg1[%c0, %c0_0] : memref<64x32xf32, #tpu.memory_space<vmem>>, vector<64x32xf32>
    %c0_1 = arith.constant 0 : index
    %c0_2 = arith.constant 0 : index
    %1 = vector.load %arg2[%c0_1, %c0_2] : memref<32x768xf32, #tpu.memory_space<vmem>>, vector<32x768xf32>
    %cst = arith.constant dense<0.000000e+00> : vector<64x768xf32>
    %2 = tpu.matmul %0, %1, %cst {dimension_numbers = #tpu.dot_dimension_numbers<[1], [0], [0], [1], [0, 0, 1, 1], [], []>} : vector<64x32xf32>, vector<32x768xf32>, vector<64x768xf32> -> vector<64x768xf32>
    %c0_3 = arith.constant 0 : index
    %c0_4 = arith.constant 0 : index
    %3 = vector.load %arg3[%c0_3, %c0_4] : memref<1x768xf32, #tpu.memory_space<vmem>>, vector<1x768xf32>
    %4 = vector.broadcast %3 : vector<1x768xf32> to vector<64x768xf32>
    %5 = arith.addf %2, %4 : vector<64x768xf32>
    %6 = vector.extract_strided_slice %5 {offsets = [0, 0], sizes = [64, 384], strides = [1, 1]} : vector<64x768xf32> to vector<64x384xf32>
    %c0_5 = arith.constant 0 : index
    %c0_6 = arith.constant 0 : index
    %7 = vector.load %arg4[%c0_5, %c0_6] : memref<64x384xf32, #tpu.memory_space<vmem>>, vector<64x384xf32>
    tpu.vector_store %arg4[%c0_5, %c0_6], %6 {strides = array<i32>} : memref<64x384xf32, #tpu.memory_space<vmem>>, vector<64x384xf32>,
    %8 = vector.extract_strided_slice %5 {offsets = [0, 384], sizes = [64, 384], strides = [1, 1]} : vector<64x768xf32> to vector<64x384xf32>
    %c0_7 = arith.constant 0 : index
    %c0_8 = arith.constant 0 : index
    %9 = vector.load %arg5[%c0_7, %c0_8] : memref<64x384xf32, #tpu.memory_space<vmem>>, vector<64x384xf32>
    tpu.vector_store %arg5[%c0_7, %c0_8], %8 {strides = array<i32>} : memref<64x384xf32, #tpu.memory_space<vmem>>, vector<64x384xf32>,
    return
  }
  func.func @transform_0(%arg0: i32) -> (i32, i32) {
    %c0_i32 = arith.constant 0 : i32
    %c0_i32_0 = arith.constant 0 : i32
    return %arg0, %c0_i32 : i32, i32
  }
  func.func @transform_1(%arg0: i32) -> (i32, i32) {
    %c0_i32 = arith.constant 0 : i32
    %c0_i32_0 = arith.constant 0 : i32
    %c0_i32_1 = arith.constant 0 : i32
    return %c0_i32, %c0_i32_0 : i32, i32
  }
  func.func @transform_2(%arg0: i32) -> (i32, i32) {
    %c0_i32 = arith.constant 0 : i32
    %c0_i32_0 = arith.constant 0 : i32
    %c0_i32_1 = arith.constant 0 : i32
    return %c0_i32, %c0_i32_0 : i32, i32
  }
  func.func @transform_3(%arg0: i32) -> (i32, i32) {
    %c0_i32 = arith.constant 0 : i32
    %c0_i32_0 = arith.constant 0 : i32
    return %arg0, %c0_i32 : i32, i32
  }
  func.func @transform_4(%arg0: i32) -> (i32, i32) {
    %c0_i32 = arith.constant 0 : i32
    %c0_i32_0 = arith.constant 0 : i32
    return %arg0, %c0_i32 : i32, i32
  }
}

</mosaic_0001>

<bundles_post_ra>
// kernel: tpu_custom_call.1
= control target key start
LH: loop header
LB: loop body
LE: loop exit
PB: predicated region body
PF: predicated region fallthrough
CT: control target
= control target key end

     0   :  { %10 = vsyncpa [#allocation3], 0  ;;  %s871_s0 = inlined_call_operand.vmem [shape: f32[64,32], index: 0, kind: input, shape index: {}]   ;;  %s872_s1 = inlined_call_operand.hbm [shape: f32[32,768], index: 1, kind: input, shape index: {}]   ;;  %s873_s2 = inlined_call_operand.vmem [shape: f32[1,768], index: 2, kind: input, shape index: {}]   ;;  %s874_s3 = inlined_call_operand.hbm [shape: f32[64,384], index: 3, kind: output, shape index: {0}]   ;;  %s875_s4 = inlined_call_operand.hbm [shape: f32[64,384], index: 4, kind: output, shape index: {1}]  }
   0x1   :  { %11 = vsyncpa [#allocation4], 0 }
   0x2   :  { %12 = vsyncpa [#allocation7], 0  ;;  %s673_s15 = smov [#allocation2]   ;;  %s601_s19 = scalar_lea.hbm %s872_s1, 3072 }
   0x3   :  { %s20_s16 = sshll.u32 %s673_s15, 4  ;;  %p602_p0 = scmp.ne.s32.totalorder %s872_s1, %s601_s19  ;;  %s21_s16 = int_to_ptr.vmem [resolvable:$true] %s20_s16 }
   0x4   :  { %p605_p1 = scmp.lt.u32.totalorder %s601_s19, %s872_s1 }
   0x6   :  { %p607_p2 = pnand %p605_p1, %p602_p0 }
   0x8   :  { %610 = shalt.err (!%p607_p2)
}
   0x9   :  { %s611_s24 = scalar_lea.vmem %s21_s16, 3072  ;;  %p616_p4 = scmp.lt.s32.totalorder %s21_s16, %s21_s16 }
   0xa   :  { %p612_p3 = scmp.ne.s32.totalorder %s21_s16, %s611_s24  ;;  %p617_p5 = scmp.lt.s32.totalorder %s611_s24, %s611_s24 }
   0xc   :  { %p618_p6 = por %p617_p5, %p616_p4 }
   0xe   :  { %p619_p7 = pnand %p618_p6, %p612_p3 }
  0x10   :  { %622 = shalt.err (!%p619_p7)
}
  0x11   :  { %s674_s25 = smov 768   ;;  %s675_s26 = smov 48  }
  0x12   :  { %26 = dma.hbm_to_vmem [thread:$0]  %s872_s1, 3072, %s21_s16, [#allocation3], %s674_s25, %s674_s25, %s675_s26  }
  0x13   :  { %667 = dma.done.wait [#allocation3], 3072  }
  0x14   :  { %668 = vsyncadd [#allocation3], 4294964224  ;;  %v676_v0 = vmov 0.0   ;;  %v41_v1 = vld [vmem:[#allocation2 + $0x8] sm:$0xff]  ;;  %v47_v2 = vld [vmem:[#allocation2 + $0x38] sm:$0xff]  ;;  %vm96_vm0 = vcmask 261120   ;;  %v66_v45 = vlaneseq }
  0x15   :  { %185 = vmatprep.mubr.f32.mxu0 %v676_v0  ;;  %209 = vmatprep.mubr.f32.mxu1 %v676_v0  ;;  %v40_v3 = vld [vmem:[#allocation2] sm:$0xff]  ;;  %v565_v4 = vpack.c.bf16 %v47_v2, %v41_v1  ;;  %v46_v5 = vld [vmem:[#allocation2 + $0x30] sm:$0xff]  ;;  %v53_v6 = vld [vmem:[#allocation2 + $0x68] sm:$0xff]  ;;  %s678_s20 = smov [#allocation6]  }
  0x16   :  { %v59_v7 = vld [vmem:[#allocation2 + $0x98] sm:$0xff]  ;;  %v567_v8 = vpack.c.bf16 %v46_v5, %v40_v3  ;;  %v52_v10 = vld [vmem:[#allocation2 + $0x60] sm:$0xff]  ;;  %v58_v11 = vld [vmem:[#allocation2 + $0x90] sm:$0xff]  ;;  %v67_v46 = vshrl.u32 %v66_v45, 7  ;;  %s525_s21 = sshll.u32 %s678_s20, 4  ;;  %s835_s21 = int_to_ptr.vmem [resolvable:$true] %s525_s21 }
  0x17   :  { %v569_v9 = vpack.c.bf16 %v59_v7, %v53_v6  ;;  %566 = vmatprep.subr.bf16.mxu0 %v565_v4  ;;  %589 = vmatprep.subr.bf16.mxu1 %v565_v4  ;;  %v43_v12 = vld [vmem:[#allocation2 + $0x18] sm:$0xff]  ;;  %v49_v13 = vld [vmem:[#allocation2 + $0x48] sm:$0xff]  ;;  %v571_v14 = vpack.c.bf16 %v58_v11, %v52_v10  ;;  %v42_v17 = vld [vmem:[#allocation2 + $0x10] sm:$0xff] }
  0x18   :  { %568 = vmatpush1.bf16.msra.mxu0 %v567_v8  ;;  %591 = vmatpush1.bf16.msra.mxu1 %v567_v8  ;;  %v45_v15 = vld [vmem:[#allocation2 + $0x28] sm:$0xff]  ;;  %v51_v16 = vld [vmem:[#allocation2 + $0x58] sm:$0xff]  ;;  %v573_v18 = vpack.c.bf16 %v49_v13, %v43_v12  ;;  %v48_v20 = vld [vmem:[#allocation2 + $0x40] sm:$0xff]  ;;  %v68_v47 = vsub.s32 0, %v67_v46  ;;  %v72_v49 = vsub.s32 1, %v67_v46  ;;  %v76_v10 = vsub.s32 2, %v67_v46 }
  0x19   :  { %570 = vmatprep.subr.bf16.mxu0 %v569_v9  ;;  %590 = vmatprep.subr.bf16.mxu1 %v569_v9  ;;  %v581_v19 = vpack.c.bf16 %v51_v16, %v45_v15  ;;  %v44_v21 = vld [vmem:[#allocation2 + $0x20] sm:$0xff]  ;;  %v50_v22 = vld [vmem:[#allocation2 + $0x50] sm:$0xff]  ;;  %v55_v24 = vld [vmem:[#allocation2 + $0x78] sm:$0xff]  ;;  %v575_v27 = vpack.c.bf16 %v48_v20, %v42_v17  ;;  %v84_v11 = vsub.s32 4, %v67_v46  ;;  %v88_v15 = vsub.s32 5, %v67_v46 }
  0x1a   :  { %v32_v23 = vld [vmem:[%s871_s0] sm:$0xff]  ;;  %v61_v25 = vld [vmem:[#allocation2 + $0xa8] sm:$0xff]  ;;  %v583_v28 = vpack.c.bf16 %v50_v22, %v44_v21  ;;  %v63_v30 = vld [vmem:[#allocation2 + $0xb8] sm:$0xff] }
  0x1b   :  { %v36_v26 = vld [vmem:[%s871_s0 + $0x20] sm:$0xff]  ;;  %v57_v29 = vld [vmem:[#allocation2 + $0x88] sm:$0xff]  ;;  %v54_v31 = vld [vmem:[#allocation2 + $0x70] sm:$0xff]  ;;  %v577_v32 = vpack.c.bf16 %v61_v25, %v55_v24 }
  0x1c   :  { %572 = vmatpush1.bf16.msra.mxu0 %v571_v14  ;;  %592 = vmatpush1.bf16.msra.mxu1 %v571_v14  ;;  %v585_v33 = vpack.c.bf16 %v63_v30, %v57_v29  ;;  %v60_v34 = vld [vmem:[#allocation2 + $0xa0] sm:$0xff]  ;;  %v62_v36 = vld [vmem:[#allocation2 + $0xb0] sm:$0xff]  ;;  %v33_v37 = vld [vmem:[%s871_s0 + $0x8] sm:$0xff]  ;;  %v80_v14 = vsub.s32 3, %v67_v46 }
  0x1d   :  { %574 = vmatprep.subr.bf16.mxu1 %v573_v18  ;;  %582 = vmatprep.subr.bf16.mxu0 %v581_v19  ;;  %v56_v35 = vld [vmem:[#allocation2 + $0x80] sm:$0xff]  ;;  %v37_v38 = vld [vmem:[%s871_s0 + $0x28] sm:$0xff]  ;;  %v579_v39 = vpack.c.bf16 %v60_v34, %v54_v31  ;;  %v34_v41 = vld [vmem:[%s871_s0 + $0x10] sm:$0xff] }
  0x1e   :  { %v587_v40 = vpack.c.bf16 %v62_v36, %v56_v35  ;;  %v38_v42 = vld [vmem:[%s871_s0 + $0x30] sm:$0xff]  ;;  %v35_v43 = vld [vmem:[%s871_s0 + $0x18] sm:$0xff]  ;;  %v64_v48 = vld [vmem:[%s873_s2] sm:$0x3f]  ;;  %s677_s2 = smov [#allocation5]  }
  0x1f   :  { %541 = vmatmul.mubr.msk.f32.vlgmr.msra.gmra.mrb[0].mxu0 %vm96_vm0, %v32_v23  ;;  %545 = vmatmul.mubr.msk.f32.vlgmr.msra.gmra.mrb[0].mxu1 %vm96_vm0, %v36_v26  ;;  %v39_v44 = vld [vmem:[%s871_s0 + $0x38] sm:$0xff]  ;;  %v69_v50 = vrot.slane %v64_v48, %v68_v47  ;;  %v73_v51 = vrot.slane %v64_v48, %v72_v49  ;;  %v793_v22 = vrot.slane %v64_v48, %v76_v10  ;;  %s513_s19 = sshll.u32 %s677_s2, 4  ;;  %s829_s19 = int_to_ptr.vmem [resolvable:$true] %s513_s19 }
  0x20   :  { %576 = vmatpush1.bf16.msra.mxu1 %v575_v27  ;;  %584 = vmatpush1.bf16.msra.mxu0 %v583_v28  ;;  %v799_v27 = vrot.slane %v64_v48, %v88_v15  ;;  %s623_s22 = scalar_lea.vmem %s829_s19, 3072  ;;  %p628_p9 = scmp.lt.s32.totalorder %s829_s19, %s829_s19 }
  0x21   :  { %191 = vmatprep.mubr.f32.mxu0 %v676_v0  ;;  %215 = vmatprep.mubr.f32.mxu1 %v676_v0  ;;  %p624_p8 = scmp.ne.s32.totalorder %s829_s19, %s623_s22  ;;  %p629_p10 = scmp.lt.s32.totalorder %s623_s22, %s623_s22 }
  0x22   :  { %578 = vmatprep.subr.bf16.mxu1 %v577_v32  ;;  %586 = vmatprep.subr.bf16.mxu0 %v585_v33 }
  0x23   :  { %542 = vmatmul.mubr.msk.f32.gmra.mrb[2].mxu0 %vm96_vm0, %v33_v37  ;;  %546 = vmatmul.mubr.msk.f32.gmra.mrb[2].mxu1 %vm96_vm0, %v37_v38  ;;  %p630_p11 = por %p629_p10, %p628_p9 }
  0x24   :  { %197 = vmatprep.mubr.f32.mxu0 %v676_v0  ;;  %221 = vmatprep.mubr.f32.mxu1 %v676_v0 }
  0x25   :  { %580 = vmatpush1.bf16.msra.mxu1 %v579_v39  ;;  %588 = vmatpush1.bf16.msra.mxu0 %v587_v40  ;;  %p631_p12 = pnand %p630_p11, %p624_p8 }
  0x27   :  { %543 = vmatmul.mubr.msk.f32.gmra.mrb[4].mxu0 %vm96_vm0, %v34_v41  ;;  %547 = vmatmul.mubr.msk.f32.gmra.mrb[4].mxu1 %vm96_vm0, %v38_v42 }
  0x28   :  { %203 = vmatprep.mubr.f32.mxu0 %v676_v0  ;;  %227 = vmatprep.mubr.f32.mxu1 %v676_v0 }
  0x2b   :  { %544 = vmatmul.mubr.msk.f32.gmra.mrb[6].mxu0 %vm96_vm0, %v35_v43  ;;  %548 = vmatmul.mubr.msk.f32.gmra.mrb[6].mxu1 %vm96_vm0, %v39_v44 }
  0x2c   :  { %298 = vmatprep.mubr.f32.mxu1 %v676_v0  ;;  %411 = vmatprep.mubr.f32.mxu0 %v676_v0 }
  0x2f   :  { %549 = vmatmul.mubr.msk.f32.vlgmr.msra.gmra.mrb[8].mxu1 %vm96_vm0, %v32_v23  ;;  %557 = vmatmul.mubr.msk.f32.vlgmr.msra.gmra.mrb[8].mxu0 %vm96_vm0, %v32_v23  ;;  %v795_v23 = vrot.slane %v64_v48, %v84_v11 }
  0x30   :  { %304 = vmatprep.mubr.f32.mxu1 %v676_v0  ;;  %417 = vmatprep.mubr.f32.mxu0 %v676_v0 }
  0x33   :  { %550 = vmatmul.mubr.msk.f32.gmra.mrb[10].mxu1 %vm96_vm0, %v33_v37  ;;  %558 = vmatmul.mubr.msk.f32.gmra.mrb[10].mxu0 %vm96_vm0, %v33_v37 }
  0x34   :  { %310 = vmatprep.mubr.f32.mxu1 %v676_v0  ;;  %423 = vmatprep.mubr.f32.mxu0 %v676_v0 }
  0x37   :  { %551 = vmatmul.mubr.msk.f32.gmra.mrb[12].mxu1 %vm96_vm0, %v34_v41  ;;  %559 = vmatmul.mubr.msk.f32.gmra.mrb[12].mxu0 %vm96_vm0, %v34_v41 }
  0x38   :  { %316 = vmatprep.mubr.f32.mxu1 %v676_v0  ;;  %429 = vmatprep.mubr.f32.mxu0 %v676_v0 }
  0x3b   :  { %552 = vmatmul.mubr.msk.f32.gmra.mrb[14].mxu1 %vm96_vm0, %v35_v43  ;;  %560 = vmatmul.mubr.msk.f32.gmra.mrb[14].mxu0 %vm96_vm0, %v35_v43 }
  0x3c   :  { %322 = vmatprep.mubr.f32.mxu1 %v676_v0  ;;  %435 = vmatprep.mubr.f32.mxu0 %v676_v0 }
  0x3f   :  { %553 = vmatmul.mubr.msk.f32.gmra.mrb[16].mxu1 %vm96_vm0, %v36_v26  ;;  %561 = vmatmul.mubr.msk.f32.gmra.mrb[16].mxu0 %vm96_vm0, %v36_v26  ;;  %v797_v26 = vrot.slane %v64_v48, %v80_v14 }
  0x40   :  { %328 = vmatprep.mubr.f32.mxu1 %v676_v0  ;;  %441 = vmatprep.mubr.f32.mxu0 %v676_v0 }
  0x43   :  { %554 = vmatmul.mubr.msk.f32.gmra.mrb[18].mxu1 %vm96_vm0, %v37_v38  ;;  %562 = vmatmul.mubr.msk.f32.gmra.mrb[18].mxu0 %vm96_vm0, %v37_v38 }
  0x44   :  { %334 = vmatprep.mubr.f32.mxu1 %v676_v0  ;;  %447 = vmatprep.mubr.f32.mxu0 %v676_v0 }
  0x47   :  { %555 = vmatmul.mubr.msk.f32.gmra.mrb[20].mxu1 %vm96_vm0, %v38_v42  ;;  %563 = vmatmul.mubr.msk.f32.gmra.mrb[20].mxu0 %vm96_vm0, %v38_v42 }
  0x48   :  { %340 = vmatprep.mubr.f32.mxu1 %v676_v0  ;;  %453 = vmatprep.mubr.f32.mxu0 %v676_v0 }
  0x4b   :  { %556 = vmatmul.mubr.msk.f32.gmra.mrb[22].mxu1 %vm96_vm0, %v39_v44  ;;  %564 = vmatmul.mubr.msk.f32.gmra.mrb[22].mxu0 %vm96_vm0, %v39_v44 }
  0xf2   :  { %v187_v52 = vpop.f32.mrb[0].mxu0  ;;  %v211_v53 = vpop.f32.mrb[0].mxu1 }
  0xf3   :  { %v188_v54 = vadd.f32 %v187_v52, %v69_v50  ;;  %v212_v55 = vadd.f32 %v211_v53, %v69_v50  ;;  %v189_v56 = vpop.f32.mrb[1].mxu0  ;;  %v213_v57 = vpop.f32.mrb[1].mxu1 }
  0xf4   :  { %v190_v58 = vadd.f32 %v189_v56, %v73_v51  ;;  %v214_v59 = vadd.f32 %v213_v57, %v73_v51 }
  0xf5   :  { %460 = vst [vmem:[#allocation5] sm:$0xff] %v188_v54  ;;  %472 = vst [vmem:[#allocation5 + $0x60] sm:$0xff] %v212_v55 }
  0xf6   :  { %461 = vst [vmem:[#allocation5 + $0x8] sm:$0xff] %v190_v58  ;;  %473 = vst [vmem:[#allocation5 + $0x68] sm:$0xff] %v214_v59  ;;  %v193_v60 = vpop.f32.mrb[2].mxu0  ;;  %v217_v61 = vpop.f32.mrb[2].mxu1 }
  0xf7   :  { %v194_v62 = vadd.f32 %v193_v60, %v69_v50  ;;  %v218_v63 = vadd.f32 %v217_v61, %v69_v50  ;;  %v195_v0 = vpop.f32.mrb[3].mxu0  ;;  %v219_v1 = vpop.f32.mrb[3].mxu1 }
  0xf8   :  { %v196_v2 = vadd.f32 %v195_v0, %v73_v51  ;;  %v220_v3 = vadd.f32 %v219_v1, %v73_v51 }
  0xf9   :  { %463 = vst [vmem:[#allocation5 + $0x18] sm:$0xff] %v194_v62  ;;  %475 = vst [vmem:[#allocation5 + $0x78] sm:$0xff] %v218_v63 }
  0xfa   :  { %464 = vst [vmem:[#allocation5 + $0x20] sm:$0xff] %v196_v2  ;;  %476 = vst [vmem:[#allocation5 + $0x80] sm:$0xff] %v220_v3  ;;  %v199_v4 = vpop.f32.mrb[4].mxu0  ;;  %v223_v5 = vpop.f32.mrb[4].mxu1 }
  0xfb   :  { %v200_v6 = vadd.f32 %v199_v4, %v69_v50  ;;  %v224_v7 = vadd.f32 %v223_v5, %v69_v50  ;;  %v201_v8 = vpop.f32.mrb[5].mxu0  ;;  %v225_v9 = vpop.f32.mrb[5].mxu1 }
  0xfc   :  { %v202_v12 = vadd.f32 %v201_v8, %v73_v51  ;;  %v226_v13 = vadd.f32 %v225_v9, %v73_v51 }
  0xfd   :  { %466 = vst [vmem:[#allocation5 + $0x30] sm:$0xff] %v200_v6  ;;  %478 = vst [vmem:[#allocation5 + $0x90] sm:$0xff] %v224_v7 }
  0xfe   :  { %467 = vst [vmem:[#allocation5 + $0x38] sm:$0xff] %v202_v12  ;;  %479 = vst [vmem:[#allocation5 + $0x98] sm:$0xff] %v226_v13  ;;  %v205_v16 = vpop.f32.mrb[6].mxu0  ;;  %v229_v17 = vpop.f32.mrb[6].mxu1 }
  0xff   :  { %v206_v18 = vadd.f32 %v205_v16, %v69_v50  ;;  %v230_v19 = vadd.f32 %v229_v17, %v69_v50  ;;  %v207_v20 = vpop.f32.mrb[7].mxu0  ;;  %v231_v21 = vpop.f32.mrb[7].mxu1 }
 0x100   :  { %v208_v24 = vadd.f32 %v207_v20, %v73_v51  ;;  %v232_v25 = vadd.f32 %v231_v21, %v73_v51 }
 0x101   :  { %469 = vst [vmem:[#allocation5 + $0x48] sm:$0xff] %v206_v18  ;;  %481 = vst [vmem:[#allocation5 + $0xa8] sm:$0xff] %v230_v19 }
 0x102   :  { %470 = vst [vmem:[#allocation5 + $0x50] sm:$0xff] %v208_v24  ;;  %482 = vst [vmem:[#allocation5 + $0xb0] sm:$0xff] %v232_v25  ;;  %v300_v28 = vpop.f32.mrb[8].mxu1  ;;  %v413_v29 = vpop.f32.mrb[8].mxu0 }
 0x103   :  { %v301_v30 = vadd.f32 %v300_v28, %v793_v22  ;;  %v414_v31 = vadd.f32 %v413_v29, %v795_v23  ;;  %v302_v32 = vpop.f32.mrb[9].mxu1  ;;  %v415_v33 = vpop.f32.mrb[9].mxu0 }
 0x104   :  { %v303_v34 = vadd.f32 %v302_v32, %v797_v26  ;;  %v416_v35 = vadd.f32 %v415_v33, %v799_v27 }
 0x105   :  { %462 = vst [vmem:[#allocation5 + $0x10] sm:$0xff] %v301_v30  ;;  %485 = vst [vmem:[#allocation6 + $0x8] sm:$0xff] %v414_v31 }
 0x106   :  { %484 = vst [vmem:[#allocation6] sm:$0xff] %v303_v34  ;;  %486 = vst [vmem:[#allocation6 + $0x10] sm:$0xff] %v416_v35  ;;  %v306_v36 = vpop.f32.mrb[10].mxu1  ;;  %v419_v37 = vpop.f32.mrb[10].mxu0 }
 0x107   :  { %v307_v38 = vadd.f32 %v306_v36, %v793_v22  ;;  %v420_v39 = vadd.f32 %v419_v37, %v795_v23  ;;  %v308_v40 = vpop.f32.mrb[11].mxu1  ;;  %v421_v41 = vpop.f32.mrb[11].mxu0 }
 0x108   :  { %v309_v42 = vadd.f32 %v308_v40, %v797_v26  ;;  %v422_v43 = vadd.f32 %v421_v41, %v799_v27 }
 0x109   :  { %465 = vst [vmem:[#allocation5 + $0x28] sm:$0xff] %v307_v38  ;;  %488 = vst [vmem:[#allocation6 + $0x20] sm:$0xff] %v420_v39 }
 0x10a   :  { %487 = vst [vmem:[#allocation6 + $0x18] sm:$0xff] %v309_v42  ;;  %489 = vst [vmem:[#allocation6 + $0x28] sm:$0xff] %v422_v43  ;;  %v312_v44 = vpop.f32.mrb[12].mxu1  ;;  %v425_v45 = vpop.f32.mrb[12].mxu0 }
 0x10b   :  { %v313_v46 = vadd.f32 %v312_v44, %v793_v22  ;;  %v426_v47 = vadd.f32 %v425_v45, %v795_v23  ;;  %v314_v48 = vpop.f32.mrb[13].mxu1  ;;  %v427_v49 = vpop.f32.mrb[13].mxu0 }
 0x10c   :  { %v315_v50 = vadd.f32 %v314_v48, %v797_v26  ;;  %v428_v51 = vadd.f32 %v427_v49, %v799_v27 }
 0x10d   :  { %468 = vst [vmem:[#allocation5 + $0x40] sm:$0xff] %v313_v46  ;;  %491 = vst [vmem:[#allocation6 + $0x38] sm:$0xff] %v426_v47 }
 0x10e   :  { %490 = vst [vmem:[#allocation6 + $0x30] sm:$0xff] %v315_v50  ;;  %492 = vst [vmem:[#allocation6 + $0x40] sm:$0xff] %v428_v51  ;;  %v318_v52 = vpop.f32.mrb[14].mxu1  ;;  %v431_v53 = vpop.f32.mrb[14].mxu0 }
 0x10f   :  { %v319_v54 = vadd.f32 %v318_v52, %v793_v22  ;;  %v432_v55 = vadd.f32 %v431_v53, %v795_v23  ;;  %v320_v56 = vpop.f32.mrb[15].mxu1  ;;  %v433_v57 = vpop.f32.mrb[15].mxu0 }
 0x110   :  { %v321_v58 = vadd.f32 %v320_v56, %v797_v26  ;;  %v434_v59 = vadd.f32 %v433_v57, %v799_v27 }
 0x111   :  { %471 = vst [vmem:[#allocation5 + $0x58] sm:$0xff] %v319_v54  ;;  %494 = vst [vmem:[#allocation6 + $0x50] sm:$0xff] %v432_v55 }
 0x112   :  { %493 = vst [vmem:[#allocation6 + $0x48] sm:$0xff] %v321_v58  ;;  %495 = vst [vmem:[#allocation6 + $0x58] sm:$0xff] %v434_v59  ;;  %v324_v60 = vpop.f32.mrb[16].mxu1  ;;  %v437_v61 = vpop.f32.mrb[16].mxu0 }
 0x113   :  { %v325_v62 = vadd.f32 %v324_v60, %v793_v22  ;;  %v438_v63 = vadd.f32 %v437_v61, %v795_v23  ;;  %v326_v0 = vpop.f32.mrb[17].mxu1  ;;  %v439_v1 = vpop.f32.mrb[17].mxu0 }
 0x114   :  { %v327_v2 = vadd.f32 %v326_v0, %v797_v26  ;;  %v440_v3 = vadd.f32 %v439_v1, %v799_v27 }
 0x115   :  { %474 = vst [vmem:[#allocation5 + $0x70] sm:$0xff] %v325_v62  ;;  %497 = vst [vmem:[#allocation6 + $0x68] sm:$0xff] %v438_v63 }
 0x116   :  { %496 = vst [vmem:[#allocation6 + $0x60] sm:$0xff] %v327_v2  ;;  %498 = vst [vmem:[#allocation6 + $0x70] sm:$0xff] %v440_v3  ;;  %v330_v4 = vpop.f32.mrb[18].mxu1  ;;  %v443_v5 = vpop.f32.mrb[18].mxu0 }
 0x117   :  { %v331_v6 = vadd.f32 %v330_v4, %v793_v22  ;;  %v444_v7 = vadd.f32 %v443_v5, %v795_v23  ;;  %v332_v8 = vpop.f32.mrb[19].mxu1  ;;  %v445_v9 = vpop.f32.mrb[19].mxu0 }
 0x118   :  { %v333_v10 = vadd.f32 %v332_v8, %v797_v26  ;;  %v446_v11 = vadd.f32 %v445_v9, %v799_v27 }
 0x119   :  { %477 = vst [vmem:[#allocation5 + $0x88] sm:$0xff] %v331_v6  ;;  %500 = vst [vmem:[#allocation6 + $0x80] sm:$0xff] %v444_v7 }
 0x11a   :  { %499 = vst [vmem:[#allocation6 + $0x78] sm:$0xff] %v333_v10  ;;  %501 = vst [vmem:[#allocation6 + $0x88] sm:$0xff] %v446_v11  ;;  %v336_v12 = vpop.f32.mrb[20].mxu1  ;;  %v449_v13 = vpop.f32.mrb[20].mxu0 }
 0x11b   :  { %v337_v14 = vadd.f32 %v336_v12, %v793_v22  ;;  %v450_v15 = vadd.f32 %v449_v13, %v795_v23  ;;  %v338_v16 = vpop.f32.mrb[21].mxu1  ;;  %v451_v17 = vpop.f32.mrb[21].mxu0 }
 0x11c   :  { %v339_v18 = vadd.f32 %v338_v16, %v797_v26  ;;  %v452_v19 = vadd.f32 %v451_v17, %v799_v27 }
 0x11d   :  { %480 = vst [vmem:[#allocation5 + $0xa0] sm:$0xff] %v337_v14  ;;  %503 = vst [vmem:[#allocation6 + $0x98] sm:$0xff] %v450_v15 }
 0x11e   :  { %502 = vst [vmem:[#allocation6 + $0x90] sm:$0xff] %v339_v18  ;;  %504 = vst [vmem:[#allocation6 + $0xa0] sm:$0xff] %v452_v19  ;;  %v342_v20 = vpop.f32.mrb[22].mxu1  ;;  %v455_v21 = vpop.f32.mrb[22].mxu0 }
 0x11f   :  { %v343_v24 = vadd.f32 %v342_v20, %v793_v22  ;;  %v456_v25 = vadd.f32 %v455_v21, %v795_v23  ;;  %v344_v28 = vpop.f32.mrb[23].mxu1  ;;  %v457_v29 = vpop.f32.mrb[23].mxu0 }
 0x120   :  { %v345_v30 = vadd.f32 %v344_v28, %v797_v26  ;;  %v458_v31 = vadd.f32 %v457_v29, %v799_v27 }
 0x121   :  { %483 = vst [vmem:[#allocation5 + $0xb8] sm:$0xff] %v343_v24  ;;  %506 = vst [vmem:[#allocation6 + $0xb0] sm:$0xff] %v456_v25 }
 0x122   :  { %505 = vst [vmem:[#allocation6 + $0xa8] sm:$0xff] %v345_v30  ;;  %507 = vst [vmem:[#allocation6 + $0xb8] sm:$0xff] %v458_v31 }
 0x123   :  { %634 = shalt.err (!%p631_p12)
}
 0x124   :  { %s635_s25 = scalar_lea.hbm %s874_s3, 3072 }
 0x125   :  { %p636_p13 = scmp.ne.s32.totalorder %s874_s3, %s635_s25  ;;  %p639_p0 = scmp.lt.u32.totalorder %s635_s25, %s874_s3 }
 0x127   :  { %p641_p1 = pnand %p639_p0, %p636_p13 }
 0x129   :  { %644 = shalt.err (!%p641_p1)
}
 0x12a   :  { %s679_s29 = smov 384   ;;  %s680_s30 = smov 24  }
 0x12b   :  { %519 = dma.vmem_to_hbm [thread:$0]  %s829_s19, 3072, %s874_s3, [#allocation4], %s679_s29, %s679_s29, %s680_s30  }
 0x12c   :  { %s645_s7 = scalar_lea.vmem %s835_s21, 3072  ;;  %p650_p3 = scmp.lt.s32.totalorder %s835_s21, %s835_s21 }
 0x12d   :  { %p646_p2 = scmp.ne.s32.totalorder %s835_s21, %s645_s7  ;;  %p651_p4 = scmp.lt.s32.totalorder %s645_s7, %s645_s7 }
 0x12f   :  { %p652_p5 = por %p651_p4, %p650_p3 }
 0x131   :  { %p653_p6 = pnand %p652_p5, %p646_p2 }
 0x133   :  { %656 = shalt.err (!%p653_p6)
}
 0x134   :  { %s657_s10 = scalar_lea.hbm %s875_s4, 3072 }
 0x135   :  { %p658_p7 = scmp.ne.s32.totalorder %s875_s4, %s657_s10  ;;  %p661_p8 = scmp.lt.u32.totalorder %s657_s10, %s875_s4 }
 0x137   :  { %p663_p9 = pnand %p661_p8, %p658_p7 }
 0x139   :  { %666 = shalt.err (!%p663_p9)
}
 0x13a   :  { %531 = dma.vmem_to_hbm [thread:$0]  %s835_s21, 3072, %s875_s4, [#allocation7], %s679_s29, %s679_s29, %s680_s30  }
 0x13b   :  { %669 = dma.done.wait [#allocation4], 3072  }
 0x13c   :  { %670 = vsyncadd [#allocation4], 4294964224 }
 0x13d   :  { %671 = dma.done.wait [#allocation7], 3072  }
 0x13e   :  { %672 = vsyncadd [#allocation7], 4294964224 }
 0x13f   :  { %538 = vsyncpa [#allocation3], 1 }
 0x140   :  { %539 = vsyncpa [#allocation4], 1 }
 0x141   :  { %540 = vsyncpa [#allocation7], 1 }

</bundles_post_ra>
